<compile_context>
chip_gen: v7x
topology: tpu7x:2x2x1
jax: 0.10.0
libtpu: 0.0.40
codegen_flags: <defaults>
</compile_context>

<pallas_src>
import jax
import jax.numpy as jnp
from jax import lax
from jax.experimental import pallas as pl
from jax.experimental.pallas import tpu as pltpu

LN_EPS = 1e-6          # the PyTorch stem builds LayerNorm(..., eps=1e-06)
MAX_TILE_ROWS = 1024   # rows per grid step; (1024x46 + 1024x24) f32 << VMEM


def _stem_kernel(x_ref, w_ref, b_ref, lnw_ref, lnb_ref, out_ref):
    f32 = jnp.float32
    # Folded conv stack: one GEMM (tile, 46) @ (46, 24) + bias.
    y = jnp.dot(x_ref[...], w_ref[...], preferred_element_type=f32) + b_ref[...]

    # Two channels-first LayerNorms (normalize over the channel axis, which is
    # the last axis here): pk -> channels [0:16], trade -> channels [16:24].
    y_pk = y[:, :16]
    y_tr = y[:, 16:]

    m_pk = jnp.mean(y_pk, axis=-1, keepdims=True)
    v_pk = jnp.mean((y_pk - m_pk) ** 2, axis=-1, keepdims=True)
    n_pk = (y_pk - m_pk) * lax.rsqrt(v_pk + LN_EPS)

    m_tr = jnp.mean(y_tr, axis=-1, keepdims=True)
    v_tr = jnp.mean((y_tr - m_tr) ** 2, axis=-1, keepdims=True)
    n_tr = (y_tr - m_tr) * lax.rsqrt(v_tr + LN_EPS)

    # Single full-width store (no masked partial writes into out_ref).
    out = jnp.concatenate([n_pk, n_tr], axis=-1)
    out_ref[...] = out * lnw_ref[...] + lnb_ref[...]


def _fold_params(p):
    """Fold conv1(+conv2)(+conv3) of each branch into one affine map.

    Conv weights are stored as [tap, (cin,) cout]; mapping from a PyTorch
    Conv2d weight (cout, cin, 1, k) is w.squeeze(2).permute(2, 1, 0).
    """
    f32 = jnp.float32
    W1, b1 = p['pk1_w'], p['pk1_b'][0]          # (2,4), (4,)
    W2, b2 = p['pk2_w'], p['pk2_b'][0]          # (2,4,8), (8,)
    W3, b3 = p['pk3_w'], p['pk3_b'][0]          # (10,8,16), (16,)

    def pk_chain(x40):                          # (40,) -> (16,)
        y1 = x40.reshape(20, 2) @ W1 + b1                               # (20,4)
        y2 = jnp.einsum('ptc,tcd->pd', y1.reshape(10, 2, 4), W2) + b2   # (10,8)
        return jnp.einsum('tc,tcd->d', y2, W3) + b3                     # (16,)

    T1, c1 = p['tr1_w'], p['tr1_b'][0]          # (3,4), (4,)
    T2, c2 = p['tr2_w'], p['tr2_b'][0]          # (2,4,8), (8,)

    def tr_chain(x6):                           # (6,) -> (8,)
        y1 = x6.reshape(2, 3) @ T1 + c1                                 # (2,4)
        return jnp.einsum('tc,tcd->d', y1, T2) + c2                     # (8,)

    b_pk = pk_chain(jnp.zeros((40,), f32))
    A_pk = jax.vmap(pk_chain)(jnp.eye(40, dtype=f32)) - b_pk            # (40,16)
    b_tr = tr_chain(jnp.zeros((6,), f32))
    A_tr = jax.vmap(tr_chain)(jnp.eye(6, dtype=f32)) - b_tr             # (6,8)

    A = jnp.zeros((46, 24), f32)
    A = A.at[:40, :16].set(A_pk)
    A = A.at[40:, 16:].set(A_tr)
    bias = jnp.concatenate([b_pk, b_tr]).reshape(1, 24)
    ln_w = jnp.concatenate([p['ln_pk_w'][0], p['ln_tr_w'][0]]).reshape(1, 24)
    ln_b = jnp.concatenate([p['ln_pk_b'][0], p['ln_tr_b'][0]]).reshape(1, 24)
    return A, bias, ln_w, ln_b


def stem_forward(combine_x, params):
    """combine_x: NCHW (B, 1, H, 46).  Returns NCHW (B, 24, H, 1)."""
    B, C, H, W = combine_x.shape
    assert C == 1 and W == 46
    N = B * H

    # (B,1,H,46) -> (B*H, 46): contiguous reshape only, no transpose passes.
    rows = combine_x.reshape(N, W).astype(jnp.float32)

    tile = min(MAX_TILE_ROWS, pl.cdiv(N, 8) * 8)
    n_pad = pl.cdiv(N, tile) * tile
    if n_pad != N:
        rows = jnp.pad(rows, ((0, n_pad - N), (0, 0)))

    # Fold the conv stack once (tiny host-side prep; hoist if params are static).
    A, bias, ln_w, ln_b = _fold_params(params)

    out = pl.pallas_call(
        _stem_kernel,
        out_shape=jax.ShapeDtypeStruct((n_pad, 24), jnp.float32),
        grid=(n_pad // tile,),
        in_specs=[
            pl.BlockSpec((tile, 46), lambda i: (i, 0)),
            pl.BlockSpec((46, 24), lambda i: (0, 0)),
            pl.BlockSpec((1, 24), lambda i: (0, 0)),
            pl.BlockSpec((1, 24), lambda i: (0, 0)),
            pl.BlockSpec((1, 24), lambda i: (0, 0)),
        ],
        out_specs=pl.BlockSpec((tile, 24), lambda i: (i, 0)),
        compiler_params=pltpu.CompilerParams(
            dimension_semantics=("parallel",)),
    )(rows, A, bias, ln_w, ln_b)

    # rows -> NCHW (B, 24, H, 1) = concat([pk16, trade8]) on the channel axis.
    out = out[:N].reshape(B, H, 24)
    return jnp.transpose(out, (0, 2, 1))[:, :, :, None]


# ---------------- pure-JAX reference (independent, un-folded conv path) -----
def _ln_last(x, w, b, eps=LN_EPS):
    m = jnp.mean(x, axis=-1, keepdims=True)
    v = jnp.mean((x - m) ** 2, axis=-1, keepdims=True)
    return (x - m) / jnp.sqrt(v + eps) * w + b


def _conv_w(x_nhwc, w_hwio, b, stride_w):
    y = jax.lax.conv_general_dilated(
        x_nhwc, w_hwio, window_strides=(1, stride_w), padding='VALID',
        dimension_numbers=('NHWC', 'HWIO', 'NHWC'),
        precision=jax.lax.Precision.HIGHEST)
    return y + b.reshape(1, 1, 1, -1)


def _reference(combine_x, p):
    xt = jnp.transpose(combine_x.astype(jnp.float32), (0, 2, 3, 1))  # NHWC
    x_pk, x_tr = xt[:, :, :40, :], xt[:, :, 40:, :]
    # pk stem
    y = _conv_w(x_pk, p['pk1_w'][None, :, None, :], p['pk1_b'][0], 2)  # (B,H,20,4)
    y = _conv_w(y, p['pk2_w'][None], p['pk2_b'][0], 2)                 # (B,H,10,8)
    y = _conv_w(y, p['pk3_w'][None], p['pk3_b'][0], 1)                 # (B,H,1,16)
    y = _ln_last(y, p['ln_pk_w'][0], p['ln_pk_b'][0])
    pk = jnp.transpose(y, (0, 3, 1, 2))                                # (B,16,H,1)
    # trade stem
    z = _conv_w(x_tr, p['tr1_w'][None, :, None, :], p['tr1_b'][0], 3)  # (B,H,2,4)
    z = _conv_w(z, p['tr2_w'][None], p['tr2_b'][0], 2)                 # (B,H,1,8)
    z = _ln_last(z, p['ln_tr_w'][0], p['ln_tr_b'][0])
    tr = jnp.transpose(z, (0, 3, 1, 2))                                # (B,8,H,1)
    return jnp.concatenate([pk, tr], axis=1)


def init_params(key):
    ks = jax.random.split(key, 10)
    def w(k, shape, scale):
        return (scale * jax.random.normal(k, shape)).astype(jnp.float32)
    return {
        # conv weights stored as [tap, (cin,) cout]
        'pk1_w': w(ks[0], (2, 4), 0.5),       'pk1_b': w(ks[1], (1, 4), 0.1),
        'pk2_w': w(ks[2], (2, 4, 8), 0.3),    'pk2_b': w(ks[3], (1, 8), 0.1),
        'pk3_w': w(ks[4], (10, 8, 16), 0.15), 'pk3_b': w(ks[5], (1, 16), 0.1),
        'ln_pk_w': jnp.ones((1, 16), jnp.float32),
        'ln_pk_b': jnp.zeros((1, 16), jnp.float32),
        'tr1_w': w(ks[6], (3, 4), 0.5),       'tr1_b': w(ks[7], (1, 4), 0.1),
        'tr2_w': w(ks[8], (2, 4, 8), 0.3),    'tr2_b': w(ks[9], (1, 8), 0.1),
        'ln_tr_w': jnp.ones((1, 8), jnp.float32),
        'ln_tr_b': jnp.zeros((1, 8), jnp.float32),
    }


if __name__ == "__main__":
    key = jax.random.PRNGKey(0)
    pkey, xkey = jax.random.split(key)
    params = init_params(pkey)

    B, H, W = 2, 16, 46               # pk uses cols [:40], trade uses cols [40:46]
    x = jax.random.normal(xkey, (B, 1, H, W), jnp.float32)

    out = jax.block_until_ready(stem_forward(x, params))
    assert out.shape == (B, 24, H, 1), out.shape

    ref = jax.block_until_ready(_reference(x, params))
    err = float(jnp.max(jnp.abs(out - ref)))
    if err > 1e-2:
        raise SystemExit(f"mismatch vs reference: max abs err {err}")
    print("KERNEL_OK")
</pallas_src>

<mosaic_0001>
module attributes {stable_mosaic.version = 11 : i64} {
  func.func @_stem_kernel(%arg0: i32, %arg1: memref<32x46xf32, #tpu.memory_space<vmem>>, %arg2: memref<46x24xf32, #tpu.memory_space<vmem>>, %arg3: memref<1x24xf32, #tpu.memory_space<vmem>>, %arg4: memref<1x24xf32, #tpu.memory_space<vmem>>, %arg5: memref<1x24xf32, #tpu.memory_space<vmem>>, %arg6: memref<32x24xf32, #tpu.memory_space<vmem>>) attributes {dimension_semantics = [#tpu.dimension_semantics<parallel>], iteration_bounds = array<i64: 1>, scalar_prefetch = 0 : i64, scratch_operands = 0 : i64, tpu.core_type = #tpu.core_type<tc>, window_params = [{transform_indices = @transform_0, window_bounds = array<i64: 32, 46>}, {pipeline_mode = #tpu.pipeline_mode<synchronous>, transform_indices = @transform_1, window_bounds = array<i64: 46, 24>}, {pipeline_mode = #tpu.pipeline_mode<synchronous>, transform_indices = @transform_2, window_bounds = array<i64: 1, 24>}, {pipeline_mode = #tpu.pipeline_mode<synchronous>, transform_indices = @transform_3, window_bounds = array<i64: 1, 24>}, {pipeline_mode = #tpu.pipeline_mode<synchronous>, transform_indices = @transform_4, window_bounds = array<i64: 1, 24>}, {transform_indices = @transform_5, window_bounds = array<i64: 32, 24>}]} {
    %c0 = arith.constant 0 : index
    %c0_0 = arith.constant 0 : index
    %0 = vector.load %arg1[%c0, %c0_0] : memref<32x46xf32, #tpu.memory_space<vmem>>, vector<32x46xf32>
    %c0_1 = arith.constant 0 : index
    %c0_2 = arith.constant 0 : index
    %1 = vector.load %arg2[%c0_1, %c0_2] : memref<46x24xf32, #tpu.memory_space<vmem>>, vector<46x24xf32>
    %cst = arith.constant dense<0.000000e+00> : vector<32x24xf32>
    %2 = tpu.matmul %0, %1, %cst {dimension_numbers = #tpu.dot_dimension_numbers<[1], [0], [0], [1], [0, 0, 1, 1], [], []>} : vector<32x46xf32>, vector<46x24xf32>, vector<32x24xf32> -> vector<32x24xf32>
    %c0_3 = arith.constant 0 : index
    %c0_4 = arith.constant 0 : index
    %3 = vector.load %arg3[%c0_3, %c0_4] : memref<1x24xf32, #tpu.memory_space<vmem>>, vector<1x24xf32>
    %4 = vector.broadcast %3 : vector<1x24xf32> to vector<32x24xf32>
    %5 = arith.addf %2, %4 : vector<32x24xf32>
    %6 = vector.extract_strided_slice %5 {offsets = [0, 0], sizes = [32, 16], strides = [1, 1]} : vector<32x24xf32> to vector<32x16xf32>
    %7 = vector.extract_strided_slice %5 {offsets = [0, 16], sizes = [32, 8], strides = [1, 1]} : vector<32x24xf32> to vector<32x8xf32>
    %cst_5 = arith.constant dense<0.000000e+00> : vector<32xf32>
    %8 = vector.multi_reduction <add>, %6, %cst_5 [1] : vector<32x16xf32> to vector<32xf32>
    %9 = vector.shape_cast %8 : vector<32xf32> to vector<32x1xf32>
    %cst_6 = arith.constant 1.600000e+01 : f32
    %10 = vector.broadcast %cst_6 : f32 to vector<32x1xf32>
    %11 = arith.divf %9, %10 : vector<32x1xf32>
    %12 = vector.broadcast %11 : vector<32x1xf32> to vector<32x16xf32>
    %13 = arith.subf %6, %12 : vector<32x16xf32>
    %14 = arith.mulf %13, %13 : vector<32x16xf32>
    %cst_7 = arith.constant dense<0.000000e+00> : vector<32xf32>
    %15 = vector.multi_reduction <add>, %14, %cst_7 [1] : vector<32x16xf32> to vector<32xf32>
    %16 = vector.shape_cast %15 : vector<32xf32> to vector<32x1xf32>
    %cst_8 = arith.constant 1.600000e+01 : f32
    %17 = vector.broadcast %cst_8 : f32 to vector<32x1xf32>
    %18 = arith.divf %16, %17 : vector<32x1xf32>
    %19 = vector.broadcast %11 : vector<32x1xf32> to vector<32x16xf32>
    %20 = arith.subf %6, %19 : vector<32x16xf32>
    %cst_9 = arith.constant 9.99999997E-7 : f32
    %21 = vector.broadcast %cst_9 : f32 to vector<32x1xf32>
    %22 = arith.addf %18, %21 : vector<32x1xf32>
    %23 = math.rsqrt %22 : vector<32x1xf32>
    %24 = vector.broadcast %23 : vector<32x1xf32> to vector<32x16xf32>
    %25 = arith.mulf %20, %24 : vector<32x16xf32>
    %cst_10 = arith.constant dense<0.000000e+00> : vector<32xf32>
    %26 = vector.multi_reduction <add>, %7, %cst_10 [1] : vector<32x8xf32> to vector<32xf32>
    %27 = vector.shape_cast %26 : vector<32xf32> to vector<32x1xf32>
    %cst_11 = arith.constant 8.000000e+00 : f32
    %28 = vector.broadcast %cst_11 : f32 to vector<32x1xf32>
    %29 = arith.divf %27, %28 : vector<32x1xf32>
    %30 = vector.broadcast %29 : vector<32x1xf32> to vector<32x8xf32>
    %31 = arith.subf %7, %30 : vector<32x8xf32>
    %32 = arith.mulf %31, %31 : vector<32x8xf32>
    %cst_12 = arith.constant dense<0.000000e+00> : vector<32xf32>
    %33 = vector.multi_reduction <add>, %32, %cst_12 [1] : vector<32x8xf32> to vector<32xf32>
    %34 = vector.shape_cast %33 : vector<32xf32> to vector<32x1xf32>
    %cst_13 = arith.constant 8.000000e+00 : f32
    %35 = vector.broadcast %cst_13 : f32 to vector<32x1xf32>
    %36 = arith.divf %34, %35 : vector<32x1xf32>
    %37 = vector.broadcast %29 : vector<32x1xf32> to vector<32x8xf32>
    %38 = arith.subf %7, %37 : vector<32x8xf32>
    %cst_14 = arith.constant 9.99999997E-7 : f32
    %39 = vector.broadcast %cst_14 : f32 to vector<32x1xf32>
    %40 = arith.addf %36, %39 : vector<32x1xf32>
    %41 = math.rsqrt %40 : vector<32x1xf32>
    %42 = vector.broadcast %41 : vector<32x1xf32> to vector<32x8xf32>
    %43 = arith.mulf %38, %42 : vector<32x8xf32>
    %44 = tpu.concatenate %25, %43 in 1 : vector<32x16xf32>, vector<32x8xf32> -> vector<32x24xf32>
    %c0_15 = arith.constant 0 : index
    %c0_16 = arith.constant 0 : index
    %45 = vector.load %arg4[%c0_15, %c0_16] : memref<1x24xf32, #tpu.memory_space<vmem>>, vector<1x24xf32>
    %46 = vector.broadcast %45 : vector<1x24xf32> to vector<32x24xf32>
    %47 = arith.mulf %44, %46 : vector<32x24xf32>
    %c0_17 = arith.constant 0 : index
    %c0_18 = arith.constant 0 : index
    %48 = vector.load %arg5[%c0_17, %c0_18] : memref<1x24xf32, #tpu.memory_space<vmem>>, vector<1x24xf32>
    %49 = vector.broadcast %48 : vector<1x24xf32> to vector<32x24xf32>
    %50 = arith.addf %47, %49 : vector<32x24xf32>
    %c0_19 = arith.constant 0 : index
    %c0_20 = arith.constant 0 : index
    %51 = vector.load %arg6[%c0_19, %c0_20] : memref<32x24xf32, #tpu.memory_space<vmem>>, vector<32x24xf32>
    tpu.vector_store %arg6[%c0_19, %c0_20], %50 {strides = array<i32>} : memref<32x24xf32, #tpu.memory_space<vmem>>, vector<32x24xf32>,
    return
  }
  func.func @transform_0(%arg0: i32) -> (i32, i32) {
    %c0_i32 = arith.constant 0 : i32
    %c0_i32_0 = arith.constant 0 : i32
    return %arg0, %c0_i32 : i32, i32
  }
  func.func @transform_1(%arg0: i32) -> (i32, i32) {
    %c0_i32 = arith.constant 0 : i32
    %c0_i32_0 = arith.constant 0 : i32
    %c0_i32_1 = arith.constant 0 : i32
    return %c0_i32, %c0_i32_0 : i32, i32
  }
  func.func @transform_2(%arg0: i32) -> (i32, i32) {
    %c0_i32 = arith.constant 0 : i32
    %c0_i32_0 = arith.constant 0 : i32
    %c0_i32_1 = arith.constant 0 : i32
    return %c0_i32, %c0_i32_0 : i32, i32
  }
  func.func @transform_3(%arg0: i32) -> (i32, i32) {
    %c0_i32 = arith.constant 0 : i32
    %c0_i32_0 = arith.constant 0 : i32
    %c0_i32_1 = arith.constant 0 : i32
    return %c0_i32, %c0_i32_0 : i32, i32
  }
  func.func @transform_4(%arg0: i32) -> (i32, i32) {
    %c0_i32 = arith.constant 0 : i32
    %c0_i32_0 = arith.constant 0 : i32
    %c0_i32_1 = arith.constant 0 : i32
    return %c0_i32, %c0_i32_0 : i32, i32
  }
  func.func @transform_5(%arg0: i32) -> (i32, i32) {
    %c0_i32 = arith.constant 0 : i32
    %c0_i32_0 = arith.constant 0 : i32
    return %arg0, %c0_i32 : i32, i32
  }
}

</mosaic_0001>

<bundles_post_ra>
// kernel: tpu_custom_call.1
= control target key start
LH: loop header
LB: loop body
LE: loop exit
PB: predicated region body
PF: predicated region fallthrough
CT: control target
= control target key end

     0   :  { %vm50_vm0 = vcmask 1045504   ;;  %vm37_vm1 = vcmask 375808   ;;  %vm388_vm2 = vmmov 1   ;;  %s389_s14 = smov 112   ;;  %vm209_vm4 = vcmask 64512   ;;  %s547_s1 = inlined_call_operand.vmem [shape: f32[46,24], index: 1, kind: input, shape index: {}]   ;;  %s548_s0 = inlined_call_operand.vmem [shape: f32[32,46], index: 0, kind: input, shape index: {}]   ;;  %s549_s2 = inlined_call_operand.vmem [shape: f32[1,24], index: 2, kind: input, shape index: {}]   ;;  %s550_s3 = inlined_call_operand.vmem [shape: f32[1,24], index: 3, kind: input, shape index: {}]   ;;  %s551_s4 = inlined_call_operand.vmem [shape: f32[1,24], index: 4, kind: input, shape index: {}]   ;;  %s552_s5 = inlined_call_operand.vmem [shape: f32[32,24], index: 5, kind: output, shape index: {}]  }
   0x1   :  { %v24_v0 = vld [vmem:[%s547_s1] sm:$0xff]  ;;  %v25_v1 = vld [vmem:[%s547_s1 + $0x8] sm:$0xff]  ;;  %v26_v2 = vld [vmem:[%s547_s1 + $0x10] sm:$0xff]  ;;  %vm139_vm5 = vcmask 130048   ;;  %vm305_vm6 = vcmask 195584  }
   0x2   :  { %v350_v3 = vpack.c.bf16 %v25_v1, %v24_v0  ;;  %v27_v4 = vld [vmem:[%s547_s1 + $0x18] sm:$0xff]  ;;  %v28_v6 = vld [vmem:[%s547_s1 + $0x20] sm:$0xff]  ;;  %v29_v7 = vld [vmem:[%s547_s1 + $0x28] sm:$0x3f] }
   0x3   :  { %v354_v5 = vpack.c.bf16 %v27_v4, %v26_v2  ;;  %v20_v8 = vld [vmem:[%s548_s0] sm:$0xff]  ;;  %v22_v9 = vld [vmem:[%s548_s0 + $0x10] sm:$0xff]  ;;  %v358_v10 = vpack.c.bf16 %v29_v7, %v28_v6  ;;  %vm359_vm3 = vmpackc.low %vm50_vm0, %vm388_vm2 }
   0x4   :  { %351 = vmatprep.subr.bf16.mxu0 %v350_v3  ;;  %364 = vmatprep.subr.bf16.mxu1 %v350_v3  ;;  %v21_v11 = vld [vmem:[%s548_s0 + $0x8] sm:$0xff]  ;;  %v23_v12 = vld [vmem:[%s548_s0 + $0x18] sm:$0xff]  ;;  %v314_v13 = vld [vmem:[%s549_s2] ss:$0 sm:$0xff] }
   0x5   :  { %353 = vmatpush3.bf16.msra.mxu0 %v350_v3  ;;  %367 = vmatpush3.bf16.msra.mxu1 %v350_v3 }
   0x6   :  { %355 = vmatprep.subr.bf16.mxu0 %v354_v5  ;;  %365 = vmatprep.subr.bf16.mxu1 %v354_v5 }
   0x7   :  { %344 = vmatprep.mubr.msk.f32.mxu0 %vm37_vm1, %v20_v8  ;;  %347 = vmatprep.mubr.msk.f32.mxu1 %vm37_vm1, %v22_v9 }
   0x9   :  { %357 = vmatpush3.bf16.msra.mxu0 %v354_v5  ;;  %368 = vmatpush3.bf16.msra.mxu1 %v354_v5 }
   0xa   :  { %360 = vmatprep.subr.msk.bf16.mxu0 %vm359_vm3, %v358_v10  ;;  %366 = vmatprep.subr.msk.bf16.mxu1 %vm359_vm3, %v358_v10 }
   0xd   :  { %363 = vmatpush3.bf16.msk.msra.mxu0 %vm359_vm3, %v358_v10  ;;  %369 = vmatpush3.bf16.msk.msra.mxu1 %vm359_vm3, %v358_v10 }
  0x10   :  { %345 = vmatmul.mubr.msk.f32.vlgmr.msra.gmra.mrb[0].mxu0 %vm37_vm1, %v21_v11  ;;  %348 = vmatmul.mubr.msk.f32.vlgmr.msra.gmra.mrb[0].mxu1 %vm37_vm1, %v23_v12 }
  0xe3   :  { %v346_v14 = vpop.f32.mrb[0].mxu0  ;;  %v349_v15 = vpop.f32.mrb[0].mxu1 }
  0xe4   :  { %v120_v16 = vpop.f32.mrb[1].mxu0  ;;  %v130_v17 = vpop.f32.mrb[1].mxu1  ;;  %v136_v20 = vadd.f32 %v349_v15, %v314_v13  ;;  %v126_v21 = vadd.f32 %v346_v14, %v314_v13 }
  0xe5   :  { %v121_v18 = vadd.f32 %v314_v13, %v120_v16  ;;  %v131_v19 = vadd.f32 %v314_v13, %v130_v17 }
  0xe6   :  { %v143_v31 = vsel %vm139_vm5, %v126_v21, 0.0  ;;  %v149_v33 = vsel %vm139_vm5, %v136_v20, 0.0 }
  0xe7   :  { %201 = vrot.lane.b32.xlu1 %v131_v19, %s389_s14  ;;  %197 = vrot.lane.b32.xlu0 %v121_v18, %s389_s14  ;;  %v140_v30 = vsel %vm139_vm5, %v121_v18, 0.0  ;;  %v146_v32 = vsel %vm139_vm5, %v131_v19, 0.0 }
  0xeb   :  { %203 = vrot.lane.b32.xlu1 %v136_v20, %s389_s14  ;;  %199 = vrot.lane.b32.xlu0 %v126_v21, %s389_s14 }
 0x159   :  { %v202_v22 = vpop.permute.xlu1 %201  ;;  %v198_v23 = vpop.permute.xlu0 %197 }
 0x15a   :  { %v210_v24 = vsel %vm209_vm4, %v198_v23, 0.0  ;;  %v216_v25 = vsel %vm209_vm4, %v202_v22, 0.0 }
 0x15b   :  { %211 = vadd.xlane.f32.xlu0 %v210_v24 }
 0x15d   :  { %v200_v26 = vpop.permute.xlu0 %199  ;;  %v204_v28 = vpop.permute.xlu1 %203 }
 0x15e   :  { %v213_v27 = vsel %vm209_vm4, %v200_v26, 0.0  ;;  %v219_v29 = vsel %vm209_vm4, %v204_v28, 0.0 }
 0x15f   :  { %217 = vadd.xlane.f32.xlu0 %v216_v25  ;;  %214 = vadd.xlane.f32.xlu1 %v213_v27 }
 0x163   :  { %220 = vadd.xlane.f32.xlu0 %v219_v29  ;;  %141 = vadd.xlane.f32.xlu1 %v140_v30 }
 0x167   :  { %144 = vadd.xlane.f32.xlu0 %v143_v31  ;;  %147 = vadd.xlane.f32.xlu1 %v146_v32 }
 0x16b   :  { %150 = vadd.xlane.f32.xlu0 %v149_v33 }
 0x1e8   :  { %v212_v34 = vpop.xlane.xlu0 %211 }
 0x1e9   :  { %v223_v35 = vmul.f32 0.125, %v212_v34 }
 0x1eb   :  { %v469_v36 = vsub.f32 %v121_v18, %v223_v35 }
 0x1ec   :  { %v215_v37 = vpop.xlane.xlu1 %214  ;;  %v218_v38 = vpop.xlane.xlu0 %217 }
 0x1ed   :  { %v224_v39 = vmul.f32 0.125, %v215_v37  ;;  %v225_v40 = vmul.f32 0.125, %v218_v38  ;;  %v231_v41 = vmul.f32 %v469_v36, %v469_v36 }
 0x1ef   :  { %v473_v42 = vsub.f32 %v126_v21, %v224_v39  ;;  %v475_v43 = vsub.f32 %v131_v19, %v225_v40  ;;  %239 = vrot.lane.b32.xlu1 %v231_v41, %s389_s14 }
 0x1f0   :  { %v221_v44 = vpop.xlane.xlu0 %220  ;;  %v142_v50 = vpop.xlane.xlu1 %141 }
 0x1f1   :  { %v226_v45 = vmul.f32 0.125, %v221_v44  ;;  %v232_v46 = vmul.f32 %v473_v42, %v473_v42  ;;  %v233_v47 = vmul.f32 %v475_v43, %v475_v43  ;;  %v153_v52 = vmul.f32 0.0625, %v142_v50  ;;  %v320_v44 = vld [vmem:[%s550_s3] ss:$0 sm:$0xff] }
 0x1f3   :  { %v482_v48 = vsub.f32 %v136_v20, %v226_v45  ;;  %241 = vrot.lane.b32.xlu0 %v232_v46, %s389_s14  ;;  %243 = vrot.lane.b32.xlu1 %v233_v47, %s389_s14  ;;  %v489_v54 = vsub.f32 %v121_v18, %v153_v52 }
 0x1f4   :  { %v145_v51 = vpop.xlane.xlu0 %144  ;;  %v148_v53 = vpop.xlane.xlu1 %147 }
 0x1f5   :  { %v234_v49 = vmul.f32 %v482_v48, %v482_v48  ;;  %v155_v55 = vmul.f32 0.0625, %v148_v53  ;;  %v161_v59 = vmul.f32 %v489_v54, %v489_v54  ;;  %v154_v60 = vmul.f32 0.0625, %v145_v51 }
 0x1f7   :  { %245 = vrot.lane.b32.xlu1 %v234_v49, %s389_s14  ;;  %v491_v57 = vsub.f32 %v131_v19, %v155_v55  ;;  %v165_v62 = vsel %vm139_vm5, %v161_v59, 0.0  ;;  %v500_v0 = vsub.f32 %v126_v21, %v154_v60  ;;  %v321_v49 = vld [vmem:[%s551_s4] ss:$0 sm:$0xff] }
 0x1f8   :  { %v151_v56 = vpop.xlane.xlu0 %150 }
 0x1f9   :  { %v156_v58 = vmul.f32 0.0625, %v151_v56  ;;  %v163_v63 = vmul.f32 %v491_v57, %v491_v57  ;;  %v162_v3 = vmul.f32 %v500_v0, %v500_v0 }
 0x1fb   :  { %v495_v61 = vsub.f32 %v136_v20, %v156_v58  ;;  %v171_v1 = vsel %vm139_vm5, %v163_v63, 0.0  ;;  %v168_v5 = vsel %vm139_vm5, %v162_v3, 0.0 }
 0x1fd   :  { %v164_v2 = vmul.f32 %v495_v61, %v495_v61 }
 0x1ff   :  { %v174_v4 = vsel %vm139_vm5, %v164_v2, 0.0 }
 0x212   :  { %166 = vadd.xlane.f32.xlu0 %v165_v62 }
 0x216   :  { %172 = vadd.xlane.f32.xlu0 %v171_v1 }
 0x21a   :  { %175 = vadd.xlane.f32.xlu0 %v174_v4 }
 0x21b   :  { %169 = vadd.xlane.f32.xlu1 %v168_v5 }
 0x261   :  { %v240_v6 = vpop.permute.xlu1 %239 }
 0x262   :  { %v251_v7 = vsel %vm209_vm4, %v240_v6, 0.0 }
 0x263   :  { %252 = vadd.xlane.f32.xlu1 %v251_v7 }
 0x265   :  { %v242_v8 = vpop.permute.xlu0 %241  ;;  %v244_v9 = vpop.permute.xlu1 %243 }
 0x266   :  { %v254_v10 = vsel %vm209_vm4, %v242_v8, 0.0  ;;  %v257_v11 = vsel %vm209_vm4, %v244_v9, 0.0 }
 0x267   :  { %255 = vadd.xlane.f32.xlu0 %v254_v10  ;;  %258 = vadd.xlane.f32.xlu1 %v257_v11 }
 0x269   :  { %v246_v12 = vpop.permute.xlu1 %245 }
 0x26a   :  { %v260_v13 = vsel %vm209_vm4, %v246_v12, 0.0 }
 0x26b   :  { %261 = vadd.xlane.f32.xlu0 %v260_v13 }
 0x29f   :  { %v167_v14 = vpop.xlane.xlu0 %166 }
 0x2a0   :  { %v177_v16 = vmul.f32 0.0625, %v167_v14 }
 0x2a2   :  { %v181_v18 = vadd.f32 1e-06, %v177_v16 }
 0x2a3   :  { %v173_v15 = vpop.xlane.xlu0 %172 }
 0x2a4   :  { %v179_v20 = vmul.f32 0.0625, %v173_v15  ;;  %372 = vrsqrt.f32 %v181_v18 }
 0x2a6   :  { %v183_v27 = vadd.f32 1e-06, %v179_v20 }
 0x2a7   :  { %v176_v21 = vpop.xlane.xlu0 %175 }
 0x2a8   :  { %v170_v17 = vpop.xlane.xlu1 %169  ;;  %v180_v24 = vmul.f32 0.0625, %v176_v21 }
 0x2a9   :  { %v178_v19 = vmul.f32 0.0625, %v170_v17 }
 0x2aa   :  { %v184_v32 = vadd.f32 1e-06, %v180_v24 }
 0x2ab   :  { %v182_v25 = vadd.f32 1e-06, %v178_v19 }
 0x2ae   :  { %v373_v39 = vpop.eup %372 }
 0x2af   :  { %v189_v41 = vmul.f32 %v373_v39, %v489_v54 }
 0x2f0   :  { %v253_v22 = vpop.xlane.xlu1 %252 }
 0x2f1   :  { %v263_v23 = vmul.f32 0.125, %v253_v22 }
 0x2f3   :  { %v267_v26 = vadd.f32 1e-06, %v263_v23 }
 0x2f4   :  { %v256_v28 = vpop.xlane.xlu0 %255  ;;  %v259_v29 = vpop.xlane.xlu1 %258 }
 0x2f5   :  { %374 = vrsqrt.f32 %v267_v26  ;;  %v264_v30 = vmul.f32 0.125, %v256_v28  ;;  %v265_v31 = vmul.f32 0.125, %v259_v29 }
 0x2f6   :  { %376 = vrsqrt.f32 %v182_v25 }
 0x2f7   :  { %v268_v33 = vadd.f32 1e-06, %v264_v30  ;;  %v269_v34 = vadd.f32 1e-06, %v265_v31  ;;  %378 = vrsqrt.f32 %v183_v27 }
 0x2f8   :  { %v262_v35 = vpop.xlane.xlu0 %261 }
 0x2f9   :  { %380 = vrsqrt.f32 %v268_v33  ;;  %v266_v37 = vmul.f32 0.125, %v262_v35 }
 0x2fa   :  { %382 = vrsqrt.f32 %v269_v34 }
 0x2fb   :  { %384 = vrsqrt.f32 %v184_v32  ;;  %v270_v38 = vadd.f32 1e-06, %v266_v37 }
 0x2fd   :  { %386 = vrsqrt.f32 %v270_v38 }
 0x2ff   :  { %v375_v40 = vpop.eup %374 }
 0x300   :  { %v275_v45 = vmul.f32 %v375_v40, %v469_v36  ;;  %v377_v46 = vpop.eup %376 }
 0x301   :  { %v379_v47 = vpop.eup %378  ;;  %v190_v55 = vmul.f32 %v377_v46, %v500_v0 }
 0x302   :  { %v279_v50 = vsel %vm139_vm5, %v189_v41, %v275_v45  ;;  %v191_v58 = vmul.f32 %v379_v47, %v491_v57 }
 0x303   :  { %v381_v51 = vpop.eup %380  ;;  %v290_v52 = vmul.f32 %v320_v44, %v279_v50 }
 0x304   :  { %v383_v53 = vpop.eup %382  ;;  %v276_v54 = vmul.f32 %v381_v51, %v473_v42 }
 0x305   :  { %v385_v56 = vpop.eup %384  ;;  %v301_v36 = vadd.f32 %v321_v49, %v290_v52  ;;  %v277_v59 = vmul.f32 %v383_v53, %v475_v43 }
 0x306   :  { %v280_v60 = vsel %vm139_vm5, %v190_v55, %v276_v54  ;;  %v192_v1 = vmul.f32 %v385_v56, %v495_v61 }
 0x307   :  { %v387_v62 = vpop.eup %386  ;;  %306 = vst.msk [vmem:[%s552_s5] sm:$0xff] %vm305_vm6, %v301_v36  ;;  %v291_v63 = vmul.f32 %v320_v44, %v280_v60  ;;  %v281_v0 = vsel %vm139_vm5, %v191_v58, %v277_v59 }
 0x308   :  { %v292_v42 = vmul.f32 %v320_v44, %v281_v0  ;;  %v278_v2 = vmul.f32 %v387_v62, %v482_v48 }
 0x309   :  { %v302_v57 = vadd.f32 %v321_v49, %v291_v63 }
 0x30a   :  { %v303_v3 = vadd.f32 %v321_v49, %v292_v42  ;;  %v282_v43 = vsel %vm139_vm5, %v192_v1, %v278_v2 }
 0x30b   :  { %307 = vst.msk [vmem:[%s552_s5 + $0x8] sm:$0xff] %vm305_vm6, %v302_v57  ;;  %v293_v4 = vmul.f32 %v320_v44, %v282_v43 }
 0x30c   :  { %308 = vst.msk [vmem:[%s552_s5 + $0x10] sm:$0xff] %vm305_vm6, %v303_v3 }
 0x30d   :  { %v304_v5 = vadd.f32 %v321_v49, %v293_v4 }
 0x30f   :  { %309 = vst.msk [vmem:[%s552_s5 + $0x18] sm:$0xff] %vm305_vm6, %v304_v5 }

</bundles_post_ra>
